<compile_context>
chip_gen: v7x
topology: tpu7x:2x2x1
jax: 0.10.0
libtpu: 0.0.40
codegen_flags: <defaults>
</compile_context>

<pallas_src>
import functools

import jax
import jax.numpy as jnp
from jax import lax
from jax.experimental import pallas as pl
from jax.experimental.pallas import tpu as pltpu


def _flash_attn_kernel(q_ref, k_ref, v_ref, bias_ref, o_ref,
                       acc_scr, max_scr, sum_scr, *, causal, tq, tk):
    """One (batch, head, q-tile) flash-attention accumulation over kv tiles."""
    qi = pl.program_id(2)
    ki = pl.program_id(3)
    nk = pl.num_programs(3)
    neg = jnp.float32(-1e30)   # large finite negative (matches masked_fill intent)

    # ---- per-(b, h, q-tile) init of the online-softmax accumulators
    @pl.when(ki == 0)
    def _init():
        acc_scr[...] = jnp.zeros_like(acc_scr)
        max_scr[...] = jnp.full_like(max_scr, neg)
        sum_scr[...] = jnp.zeros_like(sum_scr)

    def _compute():
        q = q_ref[0, 0]                                    # (tq, dh) bf16
        k = k_ref[0, 0]                                    # (tk, dh) bf16
        v = v_ref[0, 0]                                    # (tk, dh) bf16

        # scores for this head, f32 accumulation on the MXU
        s = lax.dot_general(q, k, (((1,), (1,)), ((), ())),
                            preferred_element_type=jnp.float32)   # (tq, tk)

        # key-padding mask as an additive bias (0 valid / -1e30 padded).
        # Query-side padding is handled by the final `* m` in the wrapper
        # (identical result to the reference after masking).
        s = s + bias_ref[0]                                # (1, tk) broadcast

        if causal:
            # TODO(synk): only apply the iota mask on diagonal-straddling
            # tiles (interior tiles need the key bias only).
            row = qi * tq + lax.broadcasted_iota(jnp.int32, (tq, tk), 0)
            col = ki * tk + lax.broadcasted_iota(jnp.int32, (tq, tk), 1)
            s = jnp.where(col <= row, s, neg)

        # ---- online softmax update (f32 stats)
        m_prev = max_scr[...]                              # (tq, 1)
        m_new = jnp.maximum(m_prev, jnp.max(s, axis=-1, keepdims=True))
        alpha = jnp.exp(m_prev - m_new)
        p = jnp.exp(s - m_new)                             # (tq, tk) f32
        sum_scr[...] = alpha * sum_scr[...] + jnp.sum(p, axis=-1, keepdims=True)
        acc_scr[...] = alpha * acc_scr[...] + jnp.dot(
            p.astype(jnp.bfloat16), v, preferred_element_type=jnp.float32)
        max_scr[...] = m_new

    if causal:
        # Skip kv tiles that lie entirely above the causal diagonal.
        pl.when(ki * tk <= qi * tq + tq - 1)(_compute)
    else:
        _compute()

    # ---- finalize: normalize and emit this head's (tq, dh) output block
    @pl.when(ki == nk - 1)
    def _finalize():
        o_ref[0, 0] = (acc_scr[...] *
                       pl.reciprocal(sum_scr[...], approx=True)).astype(o_ref.dtype)


def attention_pallas(x, m, w_qkv, w_out, b_out, *, n_heads, causal,
                     tq=None, tk=None):
    B, T, D = x.shape
    assert D % n_heads == 0
    H = n_heads
    dh = D // H
    scale = dh ** (-0.5)
    out_dtype = x.dtype

    if tq is None:
        tq = min(T, 256)
    if tk is None:
        tk = min(T, 256)
    assert T % tq == 0 and T % tk == 0
    nq, nk = T // tq, T // tk

    # ---- Stage 1: QKV projection, hoisted out of the attention loop.
    # Plain XLA GEMM (bf16 operands, f32 accumulation); head-major bf16 Q/K/V.
    x_bf = x.astype(jnp.bfloat16)
    qkv = jnp.dot(x_bf, w_qkv.astype(jnp.bfloat16),
                  preferred_element_type=jnp.float32)            # (B, T, 3D) f32
    q, k, v = jnp.split(qkv, 3, axis=-1)

    def _to_heads(t):
        return jnp.transpose(t.reshape(B, T, H, dh), (0, 2, 1, 3)).astype(jnp.bfloat16)

    q = _to_heads(q * scale)            # softmax scale applied in f32, post-matmul
    k = _to_heads(k)
    v = _to_heads(v)

    # Key-padding mask as an additive f32 bias, lane-major (B, 1, T):
    # 0 where valid, -1e30 where padded.
    bias = (jnp.swapaxes(m.astype(jnp.float32), 1, 2) - 1.0) * jnp.float32(1e30)

    # ---- Stage 2: flash-attention core (Pallas).
    kernel = functools.partial(_flash_attn_kernel, causal=causal, tq=tq, tk=tk)
    o_heads = pl.pallas_call(
        kernel,
        out_shape=jax.ShapeDtypeStruct((B, H, T, dh), jnp.bfloat16),
        grid=(B, H, nq, nk),
        in_specs=[
            pl.BlockSpec((1, 1, tq, dh), lambda b, h, qi, ki: (b, h, qi, 0)),  # Q
            pl.BlockSpec((1, 1, tk, dh), lambda b, h, qi, ki: (b, h, ki, 0)),  # K
            pl.BlockSpec((1, 1, tk, dh), lambda b, h, qi, ki: (b, h, ki, 0)),  # V
            pl.BlockSpec((1, 1, tk),     lambda b, h, qi, ki: (b, 0, ki)),     # key bias
        ],
        out_specs=pl.BlockSpec((1, 1, tq, dh), lambda b, h, qi, ki: (b, h, qi, 0)),
        scratch_shapes=[
            pltpu.VMEM((tq, dh), jnp.float32),   # output accumulator
            pltpu.VMEM((tq, 1), jnp.float32),    # running max
            pltpu.VMEM((tq, 1), jnp.float32),    # running sum
        ],
        compiler_params=pltpu.CompilerParams(
            dimension_semantics=("parallel", "parallel", "parallel", "arbitrary")),
    )(q, k, v, bias)

    # ---- Stage 3: output projection as one K=D matmul + bias + padding mask.
    o = jnp.transpose(o_heads, (0, 2, 1, 3)).reshape(B, T, D)           # (B, T, D) bf16
    o = jnp.dot(o, w_out.astype(jnp.bfloat16),
                preferred_element_type=jnp.float32)
    o = o + b_out.astype(jnp.float32)
    o = o * m.astype(jnp.float32)       # query-side padding (do not remove:
                                        # fully-masked rows rely on this zeroing)
    return o.astype(out_dtype)


def attention_ref(x, m, w_qkv, w_out, b_out, *, n_heads, causal):
    """Pure-JAX f32 reference matching the PyTorch forward exactly."""
    B, T, D = x.shape
    dh = D // n_heads
    scale = dh ** (-0.5)
    qkv = x @ w_qkv
    q, k, v = jnp.split(qkv, 3, axis=-1)
    q = q.reshape(B, T, n_heads, dh)
    k = k.reshape(B, T, n_heads, dh)
    v = v.reshape(B, T, n_heads, dh)
    e = jnp.einsum('bihd,bjhd->bijh', q, k) * scale
    kpm = m[:, None, :, :] * m[:, :, None, :]            # (B, T, T, 1)
    if causal:
        tri = jnp.tril(jnp.ones((T, T), x.dtype))[None, :, :, None]
        kpm = kpm * tri
    e = jnp.where(kpm == 0, -jnp.finfo(e.dtype).max, e)
    a = jax.nn.softmax(e, axis=2)
    o = jnp.einsum('bijh,bjhd->bihd', a, v).reshape(B, T, D)
    o = o @ w_out + b_out
    return o * m


if __name__ == "__main__":
    def run_case(B, T, D, H, causal, tq=None, tk=None, seed=0):
        key = jax.random.PRNGKey(seed)
        kx, kq, ko, kb = jax.random.split(key, 4)
        x = jax.random.normal(kx, (B, T, D), jnp.float32)
        # padding mask: last batch element has a padded tail
        m = jnp.ones((B, T, 1), jnp.float32)
        pad = max(1, T // 4)
        m = m.at[B - 1, T - pad:, :].set(0.0)
        w_qkv = jax.random.normal(kq, (D, 3 * D), jnp.float32) * (D ** -0.5)
        w_out = jax.random.normal(ko, (D, D), jnp.float32) * (D ** -0.5)
        b_out = jax.random.normal(kb, (1, D), jnp.float32) * 0.01

        out = attention_pallas(x, m, w_qkv, w_out, b_out,
                               n_heads=H, causal=causal, tq=tq, tk=tk)
        out = jax.block_until_ready(out)
        ref = attention_ref(x, m, w_qkv, w_out, b_out, n_heads=H, causal=causal)
        assert out.shape == ref.shape
        err = jnp.max(jnp.abs(out - ref))
        # bf16 matmul operands (f32 accumulation) -> loosened tolerance.
        assert jnp.allclose(out, ref, atol=5e-2, rtol=5e-2), \
            f"B={B} T={T} D={D} H={H} causal={causal}: max abs diff = {err}"

    # small single-tile cases (nq = nk = 1)
    run_case(2, 8, 32, 4, causal=True)
    run_case(2, 8, 32, 4, causal=False)
    # multi-tile cases (nq = nk = 2, dh = 64): exercises the online-softmax
    # carry across kv tiles, causal tile skipping, and padded batches.
    run_case(2, 256, 256, 4, causal=True, tq=128, tk=128)
    run_case(1, 256, 256, 4, causal=False, tq=128, tk=128)

    print("KERNEL_OK")
</pallas_src>

<mosaic_0001>
module attributes {stable_mosaic.version = 11 : i64} {
  func.func @_flash_attn_kernel(%arg0: i32, %arg1: i32, %arg2: i32, %arg3: i32, %arg4: memref<1x1x8x8xbf16, #tpu.memory_space<vmem>>, %arg5: memref<1x1x8x8xbf16, #tpu.memory_space<vmem>>, %arg6: memref<1x1x8x8xbf16, #tpu.memory_space<vmem>>, %arg7: memref<1x1x8xf32, #tpu.memory_space<vmem>>, %arg8: memref<1x1x8x8xbf16, #tpu.memory_space<vmem>>, %arg9: memref<8x8xf32, #tpu.memory_space<vmem>>, %arg10: memref<8x1xf32, #tpu.memory_space<vmem>>, %arg11: memref<8x1xf32, #tpu.memory_space<vmem>>) attributes {dimension_semantics = [#tpu.dimension_semantics<parallel>, #tpu.dimension_semantics<parallel>, #tpu.dimension_semantics<parallel>, #tpu.dimension_semantics<arbitrary>], iteration_bounds = array<i64: 2, 4, 1, 1>, scalar_prefetch = 0 : i64, scratch_operands = 3 : i64, tpu.core_type = #tpu.core_type<tc>, window_params = [{transform_indices = @transform_0, window_bounds = array<i64: 1, 1, 8, 8>}, {transform_indices = @transform_1, window_bounds = array<i64: 1, 1, 8, 8>}, {transform_indices = @transform_2, window_bounds = array<i64: 1, 1, 8, 8>}, {transform_indices = @transform_3, window_bounds = array<i64: 1, 1, 8>}, {transform_indices = @transform_4, window_bounds = array<i64: 1, 1, 8, 8>}]} {
    %c0_i32 = arith.constant 0 : i32
    %0 = arith.cmpi eq, %arg3, %c0_i32 : i32
    %1 = arith.extui %0 : i1 to i32
    %cst = arith.constant -1.000000e+30 : f32
    %c0_i32_0 = arith.constant 0 : i32
    %2 = arith.cmpi ne, %1, %c0_i32_0 : i32
    scf.if %2 {
      %cst_7 = arith.constant 0.000000e+00 : f32
      %13 = vector.broadcast %cst_7 : f32 to vector<8x8xf32>
      %c0 = arith.constant 0 : index
      %c0_8 = arith.constant 0 : index
      %14 = vector.load %arg9[%c0, %c0_8] : memref<8x8xf32, #tpu.memory_space<vmem>>, vector<8x8xf32>
      tpu.vector_store %arg9[%c0, %c0_8], %13 {strides = array<i32>} : memref<8x8xf32, #tpu.memory_space<vmem>>, vector<8x8xf32>,
      %15 = vector.broadcast %cst : f32 to vector<8x1xf32>
      %c0_9 = arith.constant 0 : index
      %c0_10 = arith.constant 0 : index
      %16 = vector.load %arg10[%c0_9, %c0_10] : memref<8x1xf32, #tpu.memory_space<vmem>>, vector<8x1xf32>
      tpu.vector_store %arg10[%c0_9, %c0_10], %15 {strides = array<i32>} : memref<8x1xf32, #tpu.memory_space<vmem>>, vector<8x1xf32>,
      %cst_11 = arith.constant 0.000000e+00 : f32
      %17 = vector.broadcast %cst_11 : f32 to vector<8x1xf32>
      %c0_12 = arith.constant 0 : index
      %c0_13 = arith.constant 0 : index
      %18 = vector.load %arg11[%c0_12, %c0_13] : memref<8x1xf32, #tpu.memory_space<vmem>>, vector<8x1xf32>
      tpu.vector_store %arg11[%c0_12, %c0_13], %17 {strides = array<i32>} : memref<8x1xf32, #tpu.memory_space<vmem>>, vector<8x1xf32>,
    } else {
    }
    %c8_i32 = arith.constant 8 : i32
    %3 = arith.muli %arg3, %c8_i32 : i32
    %c8_i32_1 = arith.constant 8 : i32
    %4 = arith.muli %arg2, %c8_i32_1 : i32
    %c8_i32_2 = arith.constant 8 : i32
    %5 = arith.addi %4, %c8_i32_2 : i32
    %c1_i32 = arith.constant 1 : i32
    %6 = arith.subi %5, %c1_i32 : i32
    %7 = arith.cmpi sle, %3, %6 : i32
    %8 = arith.extui %7 : i1 to i32
    %cst_3 = arith.constant -1.000000e+30 : f32
    %c0_i32_4 = arith.constant 0 : i32
    %9 = arith.cmpi ne, %8, %c0_i32_4 : i32
    scf.if %9 {
      %c0 = arith.constant 0 : index
      %c0_7 = arith.constant 0 : index
      %c0_8 = arith.constant 0 : index
      %c0_9 = arith.constant 0 : index
      %13 = vector.load %arg4[%c0, %c0_7, %c0_8, %c0_9] : memref<1x1x8x8xbf16, #tpu.memory_space<vmem>>, vector<1x1x8x8xbf16>
      %14 = vector.shape_cast %13 : vector<1x1x8x8xbf16> to vector<8x8xbf16>
      %c0_10 = arith.constant 0 : index
      %c0_11 = arith.constant 0 : index
      %c0_12 = arith.constant 0 : index
      %c0_13 = arith.constant 0 : index
      %15 = vector.load %arg5[%c0_10, %c0_11, %c0_12, %c0_13] : memref<1x1x8x8xbf16, #tpu.memory_space<vmem>>, vector<1x1x8x8xbf16>
      %16 = vector.shape_cast %15 : vector<1x1x8x8xbf16> to vector<8x8xbf16>
      %c0_14 = arith.constant 0 : index
      %c0_15 = arith.constant 0 : index
      %c0_16 = arith.constant 0 : index
      %c0_17 = arith.constant 0 : index
      %17 = vector.load %arg6[%c0_14, %c0_15, %c0_16, %c0_17] : memref<1x1x8x8xbf16, #tpu.memory_space<vmem>>, vector<1x1x8x8xbf16>
      %18 = vector.shape_cast %17 : vector<1x1x8x8xbf16> to vector<8x8xbf16>
      %cst_18 = arith.constant dense<0.000000e+00> : vector<8x8xf32>
      %19 = tpu.matmul %14, %16, %cst_18 {dimension_numbers = #tpu.dot_dimension_numbers<[1], [1], [0], [0], [0, 0, 1, 0], [], []>} : vector<8x8xbf16>, vector<8x8xbf16>, vector<8x8xf32> -> vector<8x8xf32>
      %c0_19 = arith.constant 0 : index
      %c0_20 = arith.constant 0 : index
      %c0_21 = arith.constant 0 : index
      %20 = vector.load %arg7[%c0_19, %c0_20, %c0_21] : memref<1x1x8xf32, #tpu.memory_space<vmem>>, vector<1x1x8xf32>
      %21 = vector.shape_cast %20 : vector<1x1x8xf32> to vector<1x8xf32>
      %22 = vector.broadcast %21 : vector<1x8xf32> to vector<8x8xf32>
      %23 = arith.addf %19, %22 : vector<8x8xf32>
      %c8_i32_22 = arith.constant 8 : i32
      %24 = arith.muli %arg2, %c8_i32_22 : i32
      %25 = tpu.iota {dimensions = array<i32: 0>} : vector<8x8xi32>
      %26 = vector.broadcast %24 : i32 to vector<8x8xi32>
      %27 = arith.addi %26, %25 : vector<8x8xi32>
      %c8_i32_23 = arith.constant 8 : i32
      %28 = arith.muli %arg3, %c8_i32_23 : i32
      %29 = tpu.iota {dimensions = array<i32: 1>} : vector<8x8xi32>
      %30 = vector.broadcast %28 : i32 to vector<8x8xi32>
      %31 = arith.addi %30, %29 : vector<8x8xi32>
      %32 = arith.cmpi sle, %31, %27 : vector<8x8xi32>
      %33 = vector.broadcast %cst_3 : f32 to vector<8x8xf32>
      %34 = arith.select %32, %23, %33 : vector<8x8xi1>, vector<8x8xf32>
      %c0_24 = arith.constant 0 : index
      %c0_25 = arith.constant 0 : index
      %35 = vector.load %arg10[%c0_24, %c0_25] : memref<8x1xf32, #tpu.memory_space<vmem>>, vector<8x1xf32>
      %cst_26 = arith.constant dense<0xFF800000> : vector<8xf32>
      %36 = vector.multi_reduction <maximumf>, %34, %cst_26 [1] : vector<8x8xf32> to vector<8xf32>
      %37 = vector.shape_cast %36 : vector<8xf32> to vector<8x1xf32>
      %38 = arith.maximumf %35, %37 : vector<8x1xf32>
      %39 = arith.subf %35, %38 : vector<8x1xf32>
      %40 = math.exp %39 : vector<8x1xf32>
      %41 = vector.broadcast %38 : vector<8x1xf32> to vector<8x8xf32>
      %42 = arith.subf %34, %41 : vector<8x8xf32>
      %43 = math.exp %42 : vector<8x8xf32>
      %c0_27 = arith.constant 0 : index
      %c0_28 = arith.constant 0 : index
      %44 = vector.load %arg11[%c0_27, %c0_28] : memref<8x1xf32, #tpu.memory_space<vmem>>, vector<8x1xf32>
      %45 = arith.mulf %40, %44 : vector<8x1xf32>
      %cst_29 = arith.constant dense<0.000000e+00> : vector<8xf32>
      %46 = vector.multi_reduction <add>, %43, %cst_29 [1] : vector<8x8xf32> to vector<8xf32>
      %47 = vector.shape_cast %46 : vector<8xf32> to vector<8x1xf32>
      %48 = arith.addf %45, %47 : vector<8x1xf32>
      %c0_30 = arith.constant 0 : index
      %c0_31 = arith.constant 0 : index
      %49 = vector.load %arg11[%c0_30, %c0_31] : memref<8x1xf32, #tpu.memory_space<vmem>>, vector<8x1xf32>
      tpu.vector_store %arg11[%c0_30, %c0_31], %48 {strides = array<i32>} : memref<8x1xf32, #tpu.memory_space<vmem>>, vector<8x1xf32>,
      %c0_32 = arith.constant 0 : index
      %c0_33 = arith.constant 0 : index
      %50 = vector.load %arg9[%c0_32, %c0_33] : memref<8x8xf32, #tpu.memory_space<vmem>>, vector<8x8xf32>
      %51 = vector.broadcast %40 : vector<8x1xf32> to vector<8x8xf32>
      %52 = arith.mulf %51, %50 : vector<8x8xf32>
      %53 = arith.truncf %43 : vector<8x8xf32> to vector<8x8xbf16>
      %cst_34 = arith.constant dense<0.000000e+00> : vector<8x8xf32>
      %54 = tpu.matmul %53, %18, %cst_34 {dimension_numbers = #tpu.dot_dimension_numbers<[1], [0], [0], [1], [0, 0, 1, 1], [], []>} : vector<8x8xbf16>, vector<8x8xbf16>, vector<8x8xf32> -> vector<8x8xf32>
      %55 = arith.addf %52, %54 : vector<8x8xf32>
      %c0_35 = arith.constant 0 : index
      %c0_36 = arith.constant 0 : index
      %56 = vector.load %arg9[%c0_35, %c0_36] : memref<8x8xf32, #tpu.memory_space<vmem>>, vector<8x8xf32>
      tpu.vector_store %arg9[%c0_35, %c0_36], %55 {strides = array<i32>} : memref<8x8xf32, #tpu.memory_space<vmem>>, vector<8x8xf32>,
      %c0_37 = arith.constant 0 : index
      %c0_38 = arith.constant 0 : index
      %57 = vector.load %arg10[%c0_37, %c0_38] : memref<8x1xf32, #tpu.memory_space<vmem>>, vector<8x1xf32>
      tpu.vector_store %arg10[%c0_37, %c0_38], %38 {strides = array<i32>} : memref<8x1xf32, #tpu.memory_space<vmem>>, vector<8x1xf32>,
    } else {
    }
    %c0_i32_5 = arith.constant 0 : i32
    %10 = arith.cmpi eq, %arg3, %c0_i32_5 : i32
    %11 = arith.extui %10 : i1 to i32
    %c0_i32_6 = arith.constant 0 : i32
    %12 = arith.cmpi ne, %11, %c0_i32_6 : i32
    scf.if %12 {
      %c0 = arith.constant 0 : index
      %c0_7 = arith.constant 0 : index
      %13 = vector.load %arg9[%c0, %c0_7] : memref<8x8xf32, #tpu.memory_space<vmem>>, vector<8x8xf32>
      %c0_8 = arith.constant 0 : index
      %c0_9 = arith.constant 0 : index
      %14 = vector.load %arg11[%c0_8, %c0_9] : memref<8x1xf32, #tpu.memory_space<vmem>>, vector<8x1xf32>
      %15 = tpu.reciprocal %14 {approx = true} : vector<8x1xf32> -> vector<8x1xf32>
      %16 = vector.broadcast %15 : vector<8x1xf32> to vector<8x8xf32>
      %17 = arith.mulf %13, %16 : vector<8x8xf32>
      %18 = arith.truncf %17 : vector<8x8xf32> to vector<8x8xbf16>
      %c0_10 = arith.constant 0 : index
      %c0_11 = arith.constant 0 : index
      %c0_12 = arith.constant 0 : index
      %c0_13 = arith.constant 0 : index
      %19 = vector.load %arg8[%c0_10, %c0_11, %c0_12, %c0_13] : memref<1x1x8x8xbf16, #tpu.memory_space<vmem>>, vector<1x1x8x8xbf16>
      %20 = vector.shape_cast %19 : vector<1x1x8x8xbf16> to vector<8x8xbf16>
      %21 = vector.shape_cast %18 : vector<8x8xbf16> to vector<1x1x8x8xbf16>
      tpu.vector_store %arg8[%c0_10, %c0_11, %c0_12, %c0_13], %21 {strides = array<i32>} : memref<1x1x8x8xbf16, #tpu.memory_space<vmem>>, vector<1x1x8x8xbf16>,
    } else {
    }
    return
  }
  func.func @transform_0(%arg0: i32, %arg1: i32, %arg2: i32, %arg3: i32) -> (i32, i32, i32, i32) {
    %c0_i32 = arith.constant 0 : i32
    %c0_i32_0 = arith.constant 0 : i32
    return %arg0, %arg1, %arg2, %c0_i32 : i32, i32, i32, i32
  }
  func.func @transform_1(%arg0: i32, %arg1: i32, %arg2: i32, %arg3: i32) -> (i32, i32, i32, i32) {
    %c0_i32 = arith.constant 0 : i32
    %c0_i32_0 = arith.constant 0 : i32
    return %arg0, %arg1, %arg3, %c0_i32 : i32, i32, i32, i32
  }
  func.func @transform_2(%arg0: i32, %arg1: i32, %arg2: i32, %arg3: i32) -> (i32, i32, i32, i32) {
    %c0_i32 = arith.constant 0 : i32
    %c0_i32_0 = arith.constant 0 : i32
    return %arg0, %arg1, %arg3, %c0_i32 : i32, i32, i32, i32
  }
  func.func @transform_3(%arg0: i32, %arg1: i32, %arg2: i32, %arg3: i32) -> (i32, i32, i32) {
    %c0_i32 = arith.constant 0 : i32
    %c0_i32_0 = arith.constant 0 : i32
    return %arg0, %c0_i32, %arg3 : i32, i32, i32
  }
  func.func @transform_4(%arg0: i32, %arg1: i32, %arg2: i32, %arg3: i32) -> (i32, i32, i32, i32) {
    %c0_i32 = arith.constant 0 : i32
    %c0_i32_0 = arith.constant 0 : i32
    return %arg0, %arg1, %arg2, %c0_i32 : i32, i32, i32, i32
  }
}

</mosaic_0001>

<bundles_post_ra>
// kernel: tpu_custom_call.1
= control target key start
LH: loop header
LB: loop body
LE: loop exit
PB: predicated region body
PF: predicated region fallthrough
CT: control target
= control target key end

     0   :  { %s1383_s0 = inlined_call_operand.hbm [shape: bf16[2,4,8,8], index: 0, kind: input, shape index: {}]   ;;  %s1384_s1 = inlined_call_operand.hbm [shape: bf16[2,4,8,8], index: 1, kind: input, shape index: {}]   ;;  %s1385_s2 = inlined_call_operand.hbm [shape: bf16[2,4,8,8], index: 2, kind: input, shape index: {}]   ;;  %s1386_s3 = inlined_call_operand.vmem [shape: f32[2,1,8], index: 3, kind: input, shape index: {}]   ;;  %s1387_s4 = inlined_call_operand.hbm [shape: bf16[2,4,8,8], index: 4, kind: output, shape index: {}]  }
   0x1   :  { %1398 = sst [smem:[#allocation22_spill]] %s1384_s1 }
   0x2   :  { %9 = vsyncpa [#allocation6], 0 }
   0x3   :  { %11 = vsyncpa [#allocation6 + $0x1], 0 }
   0x4   :  { %12 = vsyncpa [#allocation9], 0 }
   0x5   :  { %14 = vsyncpa [#allocation9 + $0x1], 0 }
   0x6   :  { %15 = vsyncpa [#allocation7], 0 }
   0x7   :  { %17 = vsyncpa [#allocation7 + $0x1], 0  ;;  %s1081_s15 = smov 0   ;;  %s1083_s16 = smov 0  }
   0x8   :  { %s1085_s17 = smov 0   ;;  %s1087_s18 = smov 0  }
   0x9   :  { %s1089_s19 = smov 0   ;;  %s1091_s20 = smov 0  }
   0xa   :  { %s1093_s21 = smov 0   ;;  %s1095_s22 = smov 0  }
   0xb LB: > { %1399 = sst [smem:[#allocation15_spill]] %s1018_s15  ;;  %s1122_s23 = sadd.s32 4294967295, %s1046_s22   ;;  %s1046_s22 = sphi %s1095_s22, %s23_s22   ;;  %s1042_s21 = sphi %s1093_s21, %s1428_s21   ;;  %s1038_s20 = sphi %s1091_s20, %s1427_s20   ;;  %s1034_s19 = sphi %s1089_s19, %s1426_s19   ;;  %s1030_s18 = sphi %s1087_s18, %s1425_s18   ;;  %s1026_s17 = sphi %s1085_s17, %s1431_s17   ;;  %s1022_s16 = sphi %s1083_s16, %s1430_s16   ;;  %s1018_s15 = sphi %s1081_s15, %s1429_s15  }
   0xc   : > { %1400 = sst [smem:[#allocation16_spill]] %s1038_s20  ;;  %s713_s24 = sadd.s32 4294967294, %s1046_s22  }
   0xd   : > { %1401 = sst [smem:[#allocation17_spill]] %s1042_s21  ;;  %s45_s25 = sadd.s32 1, %s1038_s20 }
   0xe   : > { %s49_s26 = sadd.s32 1, %s1042_s21  ;;  %p47_p0 = scmp.ge.s32.totalorder %s45_s25, 4 }
   0xf   : > { %s60_s27 = sadd.s32 1, %s1026_s17  ;;  %p67_p1 = scmp.ne.s32.totalorder %s1026_s17, %s1022_s16 }
  0x10   : > { %p68_p2 = scmp.eq.s32.totalorder %s1046_s22, 0  ;;  %s1433_s25 = smov (%p47_p0, %s45_s25), 0 }
  0x11   : > { %1402 = sst [smem:[#allocation18_spill]] %s1433_s25  ;;  %s1435_s26 = smov (!%p47_p0, %s49_s26), %s1042_s21 }
  0x12   : > { %s54_s28 = ssub.s32 %s1038_s20, %s1433_s25  ;;  %p1136_p3 = por %p68_p2, %p67_p1 }
  0x13   : > { %p51_p4 = scmp.ge.s32.totalorder %s1435_s26, 2  ;;  %p73_p5 = scmp.ne.s32.totalorder %s1022_s16, %s1018_s15 }
  0x14   : > { %p74_p6 = scmp.eq.s32.totalorder %s1122_s23, 0  ;;  %p189_p7 = scmp.eq.s32.totalorder %s1122_s23, 7 }
  0x15   : > { %s1437_s26 = smov (%p51_p4, %s1435_s26), 0  ;;  %p195_p10 = scmp.eq.s32.totalorder %s713_s24, 7 }
  0x16   : > { %1404 = sst [smem:[#allocation19_spill]] %s1437_s26  ;;  %p1146_p8 = por %p74_p6, %p73_p5 }
  0x17   : > { %p1150_p9 = por %p189_p7, %p67_p1  ;;  %s53_s6 = ssub.s32 %s1042_s21, %s1437_s26 }
  0x18   : > { %s1405_s30 = scalar_select %p1146_p8, 1, 0 }
  0x19   : > { %s1406_s5 = scalar_select %p1150_p9, 1, 0 }
  0x1a   : > { %s55_s7 = sor.u32 %s54_s28, %s53_s6  ;;  %p1156_p12 = por %p195_p10, %p73_p5 }
  0x1b   : > { %p58_p11 = scmp.eq.s32.totalorder %s55_s7, 0  ;;  %p776_p13 = scmp.lt.s32.totalorder %s1046_s22, 8 }
  0x1c   : > { %s1407_s8 = scalar_select %p1156_p12, 1, 0 }
  0x1d   : > { %s1388_s9 = sand.u32 1, %s1026_s17   ;;  %s717_s12 = sshll.u32 %s1042_s21, 2 }
  0x1e   : > { %1408 = sst [smem:[#allocation20_spill]] %s1407_s8  ;;  %s1167_s11 = sshll.u32 %s1388_s9, 2 }
  0x1f   : > { %s1163_s10 = scalar_select %p58_p11, %s1026_s17, %s60_s27  }
  0x20   : > { %s225_s13 = sadd.s32 %s1038_s20, %s717_s12  ;;  %p1173_p0 = pnand %p776_p13, %p1136_p3 }
  0x21   : > { %1409 = sst [smem:[#allocation21_spill]] %s1163_s10  ;;  %s1177_s24 = sshll.u32 %s225_s13, 6 }
  0x22   : > { %s1410_s14 = scalar_select %p1173_p0, 1, 0 }
  0x23   : > { %s236_s28 = sand.u32 1, %s1046_s22   ;;  %s1411_s1 = sld [smem:[#allocation22_spill]] }
  0x24   : > { %s240_s12 = scalar_lea.vmem [#allocation8], %s1167_s11  ;;  %s1191_s9 = scalar_lea.sflag [#allocation9], %s236_s28 }
  0x25   : > { %s250_s29 = sshll.u32 %s240_s12, 4  ;;  %p1197_p4 = pneg %p1173_p0  ;;  %s1188_s29 = int_to_ptr.vmem [resolvable:$true] %s250_s29 }
  0x29   : > { %s1184_s27 = scalar_lea.hbm %s1411_s1, %s1177_s24  ;;  %s859_s12 = scalar_lea.hbm %s1411_s1, 512 }
  0x2a   : > { %s854_s13 = scalar_lea.hbm %s1184_s27, 64  ;;  %p860_p7 = scmp.lt.u32.totalorder %s1184_s27, %s1411_s1 }
  0x2b   : > { %p855_p3 = scmp.ne.s32.totalorder %s1184_s27, %s854_s13  ;;  %p861_p10 = scmp.lt.u32.totalorder %s859_s12, %s854_s13 }
  0x2c   : > { %p863_p13 = scmp.lt.u32.totalorder %s854_s13, %s1184_s27 }
  0x2d   : > { %p857_p5 = pnand %p1197_p4, %p855_p3  ;;  %p862_p11 = por %p861_p10, %p860_p7 }
  0x2f   : > { %p858_p6 = pneg %p857_p5  ;;  %p864_p1 = por %p863_p13, %p862_p11 }
  0x31   : > { %p865_p2 = pnand %p864_p1, %p858_p6 }
  0x33   : > { %868 = shalt.err (!%p865_p2)
}
  0x34   : > { %s869_s28 = scalar_lea.vmem %s1188_s29, 64  ;;  %s1048_s6 = smov [#allocation8]  }
  0x35   : > { %p870_p3 = scmp.ne.s32.totalorder %s1188_s29, %s869_s28  ;;  %s874_s7 = sshll.u32 %s1048_s6, 4  ;;  %s875_s7 = int_to_ptr.vmem [resolvable:$false] %s874_s7 }
  0x36   : > { %s876_s21 = scalar_lea.vmem %s875_s7, 128  ;;  %p877_p9 = scmp.lt.s32.totalorder %s1188_s29, %s875_s7 }
  0x37   : > { %p872_p5 = pnand %p870_p3, %p1197_p4  ;;  %p878_p8 = scmp.lt.s32.totalorder %s876_s21, %s869_s28 }
  0x39   : > { %p873_p12 = pneg %p872_p5  ;;  %p879_p7 = por %p878_p8, %p877_p9 }
  0x3b   : > { %p880_p10 = pnand %p879_p7, %p873_p12 }
  0x3d   : > { %883 = shalt.err (!%p880_p10)
}
  0x3e   : > { %768 = dma.hbm_to_vmem [thread:$0]  (!%p1173_p0), %s1184_s27, 64, %s1188_s29, %s1191_s9  }
  0x3f   : > { %p1413_p1 = scmp.lt.s32.totalorder %s1046_s22, 9  ;;  %p1414_p2 = scmp.ge.s32.totalorder %s1046_s22, 1 }
  0x40   : > { %s1233_s28 = scalar_lea.hbm %s1383_s0, %s1177_s24  ;;  %s219_s6 = scalar_lea.vmem [#allocation5], %s1167_s11 }
  0x41   : > { %p1225_p6 = pnand %p1414_p2, %p1413_p1  ;;  %s229_s7 = sshll.u32 %s219_s6, 4  ;;  %s1236_s7 = int_to_ptr.vmem [resolvable:$true] %s229_s7 }
  0x42   : > { %s1242_s21 = scalar_lea.hbm %s1385_s2, %s1177_s24  ;;  %s1416_s1 = sand.u32 1, %s1026_s17  }
  0x43   : > { %s1415_s25 = scalar_select %p1225_p6, 1, 0 }
  0x44   : > { %s216_s20 = scalar_lea.sflag [#allocation6], %s1416_s1  ;;  %s884_s10 = scalar_lea.hbm %s1233_s28, 64 }
  0x45   : > { %p885_p8 = scmp.ne.s32.totalorder %s1233_s28, %s884_s10  ;;  %s889_s8 = scalar_lea.hbm %s1383_s0, 512 }
  0x46   : > { %p890_p11 = scmp.lt.u32.totalorder %s1233_s28, %s1383_s0  ;;  %p891_p13 = scmp.lt.u32.totalorder %s889_s8, %s884_s10 }
  0x47   : > { %p887_p9 = pnand %p885_p8, %p1197_p4  ;;  %p893_p5 = scmp.lt.u32.totalorder %s884_s10, %s1233_s28 }
  0x48   : > { %p892_p3 = por %p891_p13, %p890_p11 }
  0x49   : > { %p888_p12 = pneg %p887_p9 }
  0x4a   : > { %p894_p7 = por %p893_p5, %p892_p3 }
  0x4c   : > { %p895_p10 = pnand %p894_p7, %p888_p12 }
  0x4e   : > { %898 = shalt.err (!%p895_p10)
}
  0x4f   : > { %s899_s1 = scalar_lea.vmem %s1236_s7, 64  ;;  %s1049_s24 = smov [#allocation5]  }
  0x50   : > { %p900_p1 = scmp.ne.s32.totalorder %s1236_s7, %s899_s1  ;;  %s904_s27 = sshll.u32 %s1049_s24, 4  ;;  %s905_s27 = int_to_ptr.vmem [resolvable:$false] %s904_s27 }
  0x51   : > { %s906_s15 = scalar_lea.vmem %s905_s27, 128  ;;  %p907_p9 = scmp.lt.s32.totalorder %s1236_s7, %s905_s27 }
  0x52   : > { %p902_p2 = pnand %p900_p1, %p1197_p4  ;;  %p908_p6 = scmp.lt.s32.totalorder %s906_s15, %s899_s1 }
  0x54   : > { %p903_p8 = pneg %p902_p2  ;;  %p909_p11 = por %p908_p6, %p907_p9 }
  0x56   : > { %p910_p13 = pnand %p909_p11, %p903_p8 }
  0x58   : > { %913 = shalt.err (!%p910_p13)
}
  0x59   : > { %765 = dma.hbm_to_vmem [thread:$0]  (!%p1173_p0), %s1233_s28, 64, %s1236_s7, %s216_s20  }
  0x5a   : > { %s261_s8 = scalar_lea.vmem [#allocation10], %s1167_s11  ;;  %s914_s29 = scalar_lea.hbm %s1242_s21, 64 }
  0x5b   : > { %s271_s10 = sshll.u32 %s261_s8, 4  ;;  %p915_p12 = scmp.ne.s32.totalorder %s1242_s21, %s914_s29  ;;  %s272_s10 = int_to_ptr.vmem [resolvable:$true] %s271_s10 }
  0x5c   : > { %s919_s6 = scalar_lea.hbm %s1385_s2, 512  ;;  %p920_p5 = scmp.lt.u32.totalorder %s1242_s21, %s1385_s2 }
  0x5d   : > { %p917_p6 = pnand %p915_p12, %p1197_p4  ;;  %p921_p7 = scmp.lt.u32.totalorder %s919_s6, %s914_s29 }
  0x5e   : > { %p923_p1 = scmp.lt.u32.totalorder %s914_s29, %s1242_s21 }
  0x5f   : > { %p918_p3 = pneg %p917_p6  ;;  %p922_p10 = por %p921_p7, %p920_p5 }
  0x61   : > { %p924_p2 = por %p923_p1, %p922_p10 }
  0x63   : > { %p925_p8 = pnand %p924_p2, %p918_p3 }
  0x65   : > { %928 = shalt.err (!%p925_p8)
}
  0x66   : > { %s929_s20 = scalar_lea.vmem %s272_s10, 64  ;;  %s1050_s11 = smov [#allocation10]  }
  0x67   : > { %p930_p9 = scmp.ne.s32.totalorder %s272_s10, %s929_s20  ;;  %s934_s28 = sshll.u32 %s1050_s11, 4  ;;  %s935_s28 = int_to_ptr.vmem [resolvable:$false] %s934_s28 }
  0x68   : > { %s936_s7 = scalar_lea.vmem %s935_s28, 128  ;;  %p937_p12 = scmp.lt.s32.totalorder %s272_s10, %s935_s28 }
  0x69   : > { %p932_p11 = pnand %p930_p9, %p1197_p4  ;;  %p938_p6 = scmp.lt.s32.totalorder %s936_s7, %s929_s20 }
  0x6b   : > { %p933_p13 = pneg %p932_p11  ;;  %p939_p0 = por %p938_p6, %p937_p12 }
  0x6d   : > { %p940_p5 = pnand %p939_p0, %p933_p13 }
  0x6f   : > { %943 = shalt.err (!%p940_p5)
}
  0x70   : > { %p1417_p7 = scmp.ne.s32.totalorder %s1410_s14, 0  ;;  %p1418_p3 = scmp.ne.s32.totalorder %s1415_s25, 0 }
  0x71   : > { %s1289_s26 = sand.u32 (!%p1418_p3), 1, %s1022_s16   ;;  %p1419_p0 = scmp.ne.s32.totalorder (!%p1418_p3), %s1405_s30, 0 }
  0x72   : > { %771 = dma.hbm_to_vmem [thread:$0]  (!%p1417_p7), %s1242_s21, 64, %s272_s10, %s1191_s9  }
  0x73   : > { %289 = sbr.rel (%p1418_p3) target bundleno = 949 (0x3b5), region = 36  ;;  %s1292_s27 = sshll.u32 (!%p1418_p3), %s1289_s26, 2 }
  0x74   : > { %s292_s15 = scalar_lea.sflag (!%p1418_p3), [#allocation6], %s1289_s26  ;;  %s295_s8 = scalar_lea.vmem (!%p1418_p3), [#allocation5], %s1292_s27 }
  0x7a   : > { %1005 = dma.done.wait (%p1419_p0), %s292_s15, 64  }
  0x7b   : > { %1007 = vsyncadd (%p1419_p0), %s292_s15, 4294967232  ;;  %s300_s9 = sand.u32 1, %s1122_s23   ;;  %s304_s25 = scalar_lea.vmem [#allocation8], %s1292_s27 }
  0x7c   : > { %s301_s14 = scalar_lea.sflag [#allocation9], %s300_s9 }
  0x7d   : > { %1009 = dma.done.wait (%p1419_p0), %s301_s14, 128  }
  0x7e   : > { %1011 = vsyncadd (%p1419_p0), %s301_s14, 4294967168  ;;  %vm365_vm0 = vcmask 64512   ;;  %v1051_v0 = vmov 0.0   ;;  %vm1052_vm1 = vmmov 0   ;;  %v378_v1 = vld [vmem:[%s304_s25] sm:$0xf]  ;;  %v434_v5 = vlaneseq }
  0x7f   : > { %742 = vmatprep.subr.bf16.mxu0 %v1051_v0  ;;  %366 = vst.msk [vmem:[#allocation2] sm:$0xff] %vm365_vm0, %v1051_v0  ;;  %744 = vmatprep.mubr.msk.bf16.mxu0 %vm1052_vm1, %v1051_v0  ;;  %v392_v2 = vsel %vm365_vm0, %v378_v1, 0  ;;  %v377_v3 = vld [vmem:[%s295_s8] sm:$0xf]  ;;  %vm367_vm2 = vcmask 7168   ;;  %p354_p4 = scmp.lt.s32.totalorder %s1034_s19, 1 }
  0x80   : > { %748 = vmatprep.subr.bf16.mxu1 %v1051_v0  ;;  %750 = vmatprep.mubr.msk.bf16.mxu1 %vm1052_vm1, %v1051_v0  ;;  %v1053_v4 = vmov -1e+30   ;;  %369 = vst.msk [vmem:[#allocation4] sm:$0xff] %vm367_vm2, %v1051_v0  ;;  %v435_v6 = vshrl.u32 %v434_v5, 7  ;;  %v439_v7 = vand.u32 127, %v434_v5  ;;  %v1054_v16 = vmov 0  }
  0x81   : > { %743 = vmatpush3.bf16.xpose.msra.mxu0 %v392_v2  ;;  %368 = vst.msk [vmem:[#allocation3] sm:$0xff] %vm367_vm2, %v1053_v4  ;;  %s355_s23 = scalar_select %p354_p4, %s1034_s19, 1  ;;  %846 = vset.pattern.permute.xlu0 %v1054_v16  ;;  %vm479_vm4 = vcmask 1043456   ;;  %vm539_vm5 = vcmask 60416  }
  0x82   : > { %vm442_vm3 = vcmp.le.s32.totalorder %v439_v7, %v435_v6  ;;  %847 = vset.pattern.permute.xlu1 %v1054_v16  ;;  %s313_s29 = scalar_lea.vmem [#allocation10], %s1292_s27  ;;  %s734_s13 = sshll.u32 %s1034_s19, 2 }
  0x83   : > { %s359_s10 = scalar_lea.vmem %s1386_s3, %s355_s23  ;;  %v379_v21 = vld [vmem:[%s313_s29] sm:$0xf]  ;;  %s554_s12 = sadd.s32 %s1030_s18, %s734_s13 }
  0x84   : > { %v730_v8 = vld [vmem:[%s359_s10] ss:$0 sm:$0xff]  ;;  %v481_v22 = vsel %vm479_vm4, %v379_v21, 0  ;;  %s735_s6 = sshll.u32 %s554_s12, 6  ;;  %s353_s1 = scalar_lea.vmem [#allocation11], %s1292_s27 }
  0x85   : > { %749 = vmatpush3.bf16.msra.mxu1 %v481_v22  ;;  %s558_s24 = sshll.u32 %s353_s1, 4  ;;  %s1329_s28 = scalar_lea.hbm %s1387_s4, %s735_s6  ;;  %s1331_s24 = int_to_ptr.vmem [resolvable:$true] %s558_s24 }
  0x86   : > { %v468_v38 = vld [vmem:[#allocation2] sm:$0xff]  ;;  %s542_s18 = scalar_lea.sflag [#allocation7], %s1289_s26  ;;  %s944_s19 = scalar_lea.vmem %s1331_s24, 64 }
  0x87   : > { %v460_v31 = vld [vmem:[#allocation4] sm:$0xff]  ;;  %p945_p10 = scmp.ne.s32.totalorder %s1331_s24, %s944_s19  ;;  %p1420_p1 = scmp.ne.s32.totalorder %s1406_s5, 0 }
  0x88   : > { %745 = vmatmul.mubr.msk.bf16.vlgmr.msra.gmra.mrb[0].mxu0 %vm365_vm0, %v377_v3  ;;  %v444_v17 = vld [vmem:[#allocation3] sm:$0xff]  ;;  %s1055_s7 = smov [#allocation11]  }
  0x89   : > { %p946_p2 = pnand %p945_p10, %p1420_p1  ;;  %s948_s27 = sshll.u32 %s1055_s7, 4  ;;  %s949_s27 = int_to_ptr.vmem [resolvable:$false] %s948_s27 }
  0x8a   : > { %s950_s15 = scalar_lea.vmem %s949_s27, 128  ;;  %p951_p9 = scmp.lt.s32.totalorder %s1331_s24, %s949_s27 }
  0x8b   : > { %p947_p8 = pneg %p946_p2  ;;  %p952_p11 = scmp.lt.s32.totalorder %s950_s15, %s944_s19 }
  0x8d   : > { %p953_p13 = por %p952_p11, %p951_p9 }
  0x8f   : > { %p954_p12 = pnand %p953_p13, %p947_p8 }
 0x15b   : > { %v428_v9 = vpop.f32.mrb[0].mxu0 }
 0x15c   : > { %v429_v10 = vadd.f32 %v730_v8, %v428_v9  ;;  %v746_v11 = vpop.f32.mrb[1].mxu0 }
 0x15d   : > { %v431_v12 = vpop.f32.mrb[2].mxu0 }
 0x15e   : > { %v747_v13 = vpop.f32.mrb[3].mxu0  ;;  %v443_v14 = vsel %vm442_vm3, %v429_v10, -1e+30 }
 0x15f   : > { %v445_v15 = vsel %vm365_vm0, %v443_v14, -inf }
 0x160   : > { %446 = vmax.xlane.f32.xlu0 %v445_v15 }
 0x1ed   : > { %v447_v18 = vpop.xlane.xlu0 %446 }
 0x1ee   : > { %v448_v19 = vmax.f32 %v444_v17, %v447_v18 }
 0x1f0   : > { %v449_v20 = vsub.f32 %v444_v17, %v448_v19  ;;  %525 = vst.msk [vmem:[#allocation3] sm:$0xff] %vm367_vm2, %v448_v19  ;;  %454 = vperm.xlu0 %846, %v448_v19  }
 0x1f2   : > { %v450_v29 = vmul.f32 1.442695, %v449_v20 }
 0x26f   : > { %v455_v23 = vpop.permute.xlu0 %454 }
 0x270   : > { %v457_v24 = vsub.f32 %v443_v14, %v455_v23 }
 0x272   : > { %v458_v25 = vmul.f32 1.442695, %v457_v24 }
 0x274   : > { %848 = vpow2.f32 %v458_v25 }
 0x275   : > { %850 = vpow2.f32 %v450_v29 }
 0x27e   : > { %v849_v26 = vpop.eup %848 }
 0x27f   : > { %v462_v27 = vsel %vm365_vm0, %v849_v26, 0.0  ;;  %v475_v28 = vpack.c.bf16 %v849_v26, %v849_v26  ;;  %v851_v30 = vpop.eup %850 }
 0x280   : > { %463 = vadd.xlane.f32.xlu1 %v462_v27  ;;  %v461_v32 = vmul.f32 %v851_v30, %v460_v31 }
 0x281   : > { %751 = vmatmul.mubr.msk.bf16.vlgmr.msra.gmra.mrb[0].mxu1 %vm365_vm0, %v475_v28 }
 0x291   : > { %471 = vperm.xlu1 %847, %v851_v30  }
 0x30d   : > { %v464_v33 = vpop.xlane.xlu1 %463 }
 0x30e   : > { %v465_v34 = vadd.f32 %v464_v33, %v461_v32 }
 0x310   : > { %467 = vst.msk [vmem:[#allocation4] sm:$0xff] %vm367_vm2, %v465_v34 }
 0x311   : > { %v472_v37 = vpop.permute.xlu1 %471 }
 0x312   : > { %v474_v39 = vmul.f32 %v472_v37, %v468_v38 }
 0x317   : > { %v530_v35 = vld [vmem:[#allocation4] sm:$0xff] }
 0x318   : > { %852 = vrcp.f32 %v530_v35 }
 0x322   : > { %v853_v36 = vpop.eup %852 }
 0x323   : > { %534 = vperm.xlu1 %847, %v853_v36  }
 0x354   : > { %v517_v40 = vpop.f32.mrb[0].mxu1 }
 0x355   : > { %v523_v41 = vadd.f32 %v517_v40, %v474_v39  ;;  %v752_v42 = vpop.f32.mrb[1].mxu1 }
 0x356   : > { %v520_v43 = vpop.f32.mrb[2].mxu1 }
 0x357   : > { %524 = vst.msk [vmem:[#allocation2] sm:$0xff] %vm365_vm0, %v523_v41  ;;  %v753_v44 = vpop.f32.mrb[3].mxu1 }
 0x35e   : > { %v529_v46 = vld [vmem:[#allocation2] sm:$0xff] }
 0x3a2   : > { %v535_v45 = vpop.permute.xlu1 %534 }
 0x3a3   : > { %v537_v47 = vmul.f32 %v535_v45, %v529_v46 }
 0x3a5   : > { %v538_v48 = vpack.c.bf16 %v537_v47, %v537_v47 }
 0x3a7   : > { %540 = vst.msk [vmem:[%s353_s1] sm:$0xf] %vm539_vm5, %v538_v48 }
 0x3a8   : > { %957 = shalt.err (!%p954_p12)
}
 0x3a9   : > { %s958_s26 = scalar_lea.hbm %s1329_s28, 64  ;;  %s962_s14 = scalar_lea.hbm %s1387_s4, 512 }
 0x3aa   : > { %p959_p6 = scmp.ne.s32.totalorder %s1329_s28, %s958_s26  ;;  %p963_p3 = scmp.lt.u32.totalorder %s1329_s28, %s1387_s4 }
 0x3ab   : > { %p964_p0 = scmp.lt.u32.totalorder %s962_s14, %s958_s26  ;;  %p966_p10 = scmp.lt.u32.totalorder %s958_s26, %s1329_s28 }
 0x3ac   : > { %p960_p5 = pnand %p959_p6, %p1420_p1 }
 0x3ad   : > { %p965_p4 = por %p964_p0, %p963_p3 }
 0x3ae   : > { %p961_p7 = pneg %p960_p5 }
 0x3af   : > { %p967_p2 = por %p966_p10, %p965_p4 }
 0x3b1   : > { %p968_p8 = pnand %p967_p2, %p961_p7 }
 0x3b3   : > { %971 = shalt.err (!%p968_p8)
}
 0x3b4   : > { %760 = dma.vmem_to_hbm [thread:$0]  (%p1420_p1), %s1331_s24, 64, %s1329_s28, %s542_s18  }
 0x3b5 PF: > { %s1421_s30 = sld [smem:[#allocation15_spill]]  ;;  %s1422_s21 = sld [smem:[#allocation20_spill]] }
 0x3b6   : > { %p777_p9 = scmp.ge.s32.totalorder %s1046_s22, 2 }
 0x3bb   : > { %s570_s10 = sand.u32 1, %s1421_s30   ;;  %p1423_p11 = scmp.ne.s32.totalorder %s1422_s21, 0 }
 0x3bc   : > { %s571_s29 = scalar_lea.sflag [#allocation7], %s570_s10 }
 0x3bd   : > { %p773_p13 = pnand %p777_p9, %p1423_p11 }
 0x3bf   : > { %1013 = dma.done.wait (!%p773_p13), %s571_s29, 64  }
 0x3c0   : > { %1015 = vsyncadd (!%p773_p13), %s571_s29, 4294967232  ;;  %s23_s22 = sadd.s32 1, %s1046_s22   ;;  %s1424_s5 = sld [smem:[#allocation21_spill]] }
 0x3c1   : > { %p20_p12 = scmp.ge.s32.totalorder %s23_s22, 10   ;;  %s1425_s18 = sld [smem:[#allocation16_spill]] }
 0x3c2   : > { %s1426_s19 = sld [smem:[#allocation17_spill]]  ;;  %s1427_s20 = sld [smem:[#allocation18_spill]] }
 0x3c3   : > { %s1428_s21 = sld [smem:[#allocation19_spill]]  ;;  %s1429_s15 = smov %s1022_s16 }
 0x3c4   : > { %s1430_s16 = smov %s1026_s17  ;;  %22 = sbr.rel (!%p20_p12) target bundleno = 11 (0xb), region = 120 }
 0x3c6   : > { %s1431_s17 = smov %s1424_s5 }
 0x3cb   :  { %576 = vsyncpa [#allocation6], 1 }
 0x3cc   :  { %578 = vsyncpa [#allocation6 + $0x1], 1 }
 0x3cd   :  { %579 = vsyncpa [#allocation9], 1 }
 0x3ce   :  { %581 = vsyncpa [#allocation9 + $0x1], 1 }
 0x3cf   :  { %582 = vsyncpa [#allocation7], 1 }
 0x3d0   :  { %584 = vsyncpa [#allocation7 + $0x1], 1 }

</bundles_post_ra>
